<compile_context>
chip_gen: v6e
topology: v6e:2x2x1
jax: 0.10.0
libtpu: 0.0.40
codegen_flags: <defaults>
</compile_context>

<pallas_src>
import functools

import jax
import jax.numpy as jnp
from jax import lax
from jax.experimental import pallas as pl
from jax.experimental.pallas import tpu as pltpu


def _attention_kernel(x_ref, wqkv_ref, wproj_ref, bproj_ref, o_ref, *,
                      num_heads, head_dim, scale):
    """One batch element of multi-head attention.

    x_ref     : (1, N, C)   input tokens for this batch element
    wqkv_ref  : (C, 3C)     fused qkv projection (resident, x @ Wqkv^T layout)
    wproj_ref : (C, C)      output projection (resident, x @ Wproj^T layout)
    bproj_ref : (1, C)      output projection bias (f32)
    o_ref     : (1, N, C)   output tokens for this batch element
    """
    C = num_heads * head_dim
    x = x_ref[0]                                              # (N, C), native dtype

    # Fused QKV projection: one wide, lane-dense matmul with f32 accumulation.
    qkv_f32 = jnp.dot(x, wqkv_ref[...],
                      preferred_element_type=jnp.float32)     # (N, 3C) f32
    # Native-dtype copy so every downstream matmul operand takes the fast
    # (bf16) MXU path when the module runs in reduced precision.
    qkv_lo = qkv_f32.astype(x.dtype)

    # Per-head attention.  num_heads is a compile-time constant, so a static
    # Python loop with static lane slices is used (fully unrolled).
    # TODO(synk): for long sequences (large N) add a query-tile grid axis and
    # flash-style online softmax over KV tiles so the (N, N) scores never
    # exceed VMEM (mandatory on v7x's 64 MiB VMEM at N ~ 4k).
    head_outputs = []
    for h in range(num_heads):
        lo = h * head_dim
        # Fold 1/sqrt(d) into q (N*d elements instead of N*N scores), in f32
        # before the narrowing cast.
        q = (qkv_f32[:, lo:lo + head_dim] * scale).astype(x.dtype)    # (N, d)
        k = qkv_lo[:, C + lo:C + lo + head_dim]                       # (N, d)
        v = qkv_lo[:, 2 * C + lo:2 * C + lo + head_dim]               # (N, d)

        # scores = q @ k^T without materializing a transpose: contract on the
        # minor (lane) axis of both operands; accumulate in f32 on the MXU.
        s = lax.dot_general(q, k, (((1,), (1,)), ((), ())),
                            preferred_element_type=jnp.float32)       # (N, N) f32

        # Numerically stable softmax; normalization uses the EUP approximate
        # reciprocal (separate issue slot) instead of a VPU divide.
        s = s - jnp.max(s, axis=-1, keepdims=True)
        p = jnp.exp(s)
        inv = pl.reciprocal(jnp.sum(p, axis=-1, keepdims=True), approx=True)
        p = (p * inv).astype(x.dtype)

        # attn @ v in the input dtype (bf16 inputs -> bf16 MXU path).
        o_h = jnp.dot(p, v, preferred_element_type=jnp.float32)       # (N, d) f32
        head_outputs.append(o_h)

    # Concatenate heads and do a single full-depth output projection.
    ctx = jnp.concatenate(head_outputs, axis=-1).astype(x.dtype)      # (N, C)
    out = jnp.dot(ctx, wproj_ref[...],
                  preferred_element_type=jnp.float32)                 # (N, C) f32
    out = out + bproj_ref[...]                                        # f32 bias
    o_ref[0] = out.astype(o_ref.dtype)


def attention_forward(x, w_qkv, w_proj, b_proj, num_heads):
    """x: (B, N, C). w_qkv: (3C, C) [PyTorch layout], w_proj: (C, C), b_proj: (C,)."""
    B, N, C = x.shape
    d = C // num_heads
    scale = d ** (-0.5)

    # ---- glue (plain JAX): PyTorch (out,in) -> row-major x @ W^T layout ----
    wqkv_t = w_qkv.T.astype(x.dtype)                          # (C, 3C)
    wproj_t = w_proj.T.astype(x.dtype)                        # (C, C)
    bproj = b_proj.reshape(1, C).astype(jnp.float32)          # (1, C) f32

    kernel = functools.partial(_attention_kernel,
                               num_heads=num_heads, head_dim=d, scale=scale)

    return pl.pallas_call(
        kernel,
        out_shape=jax.ShapeDtypeStruct((B, N, C), x.dtype),
        grid_spec=pltpu.PrefetchScalarGridSpec(
            num_scalar_prefetch=0,
            grid=(B,),
            in_specs=[
                pl.BlockSpec((1, N, C), lambda b: (b, 0, 0)),    # x tile per batch
                pl.BlockSpec((C, 3 * C), lambda b: (0, 0)),      # Wqkv^T, resident
                pl.BlockSpec((C, C), lambda b: (0, 0)),          # Wproj^T, resident
                pl.BlockSpec((1, C), lambda b: (0, 0)),          # proj bias, resident
            ],
            out_specs=pl.BlockSpec((1, N, C), lambda b: (b, 0, 0)),
        ),
        # Batch axis is embarrassingly parallel -> megacore sharding on v7x.
        # TODO(synk): raise vmem_limit_bytes when enlarging token tiles / N at
        # real ViT shapes (keep headroom below v7x's 64 MiB physical VMEM).
        compiler_params=pltpu.CompilerParams(
            dimension_semantics=("parallel",)),
    )(x, wqkv_t, wproj_t, bproj)


def attention_reference(x, w_qkv, w_proj, b_proj, num_heads):
    """Pure-JAX reference mirroring the PyTorch forward."""
    B, N, C = x.shape
    d = C // num_heads
    scale = d ** (-0.5)
    qkv = x @ w_qkv.T                                              # (B, N, 3C)
    qkv = qkv.reshape(B, N, 3, num_heads, d).transpose(2, 0, 3, 1, 4)
    q, k, v = qkv[0], qkv[1], qkv[2]                               # (B, H, N, d)
    attn = (q @ jnp.swapaxes(k, -2, -1)) * scale                   # (B, H, N, N)
    attn = jax.nn.softmax(attn, axis=-1)
    out = (attn @ v).transpose(0, 2, 1, 3).reshape(B, N, C)        # (B, N, C)
    return out @ w_proj.T + b_proj


if __name__ == "__main__":
    # Small shapes consistent with the module: B=2, N=8 tokens, C=32 dim, 8 heads.
    B, N, C = 2, 8, 32
    num_heads = 8

    key = jax.random.PRNGKey(0)
    kx, kqkv, kproj, kb = jax.random.split(key, 4)

    x = jax.random.normal(kx, (B, N, C), dtype=jnp.float32)
    # nn.Linear(dim, dim*3, bias=False): weight (3C, C)
    w_qkv = jax.random.normal(kqkv, (3 * C, C), dtype=jnp.float32) * 0.05
    # nn.Linear(dim, dim): weight (C, C), bias (C,)
    w_proj = jax.random.normal(kproj, (C, C), dtype=jnp.float32) * 0.05
    b_proj = jax.random.normal(kb, (C,), dtype=jnp.float32) * 0.05

    out = attention_forward(x, w_qkv, w_proj, b_proj, num_heads)
    out = jax.block_until_ready(out)

    ref = attention_reference(x, w_qkv, w_proj, b_proj, num_heads)
    assert out.shape == (B, N, C)
    # Tolerance loosened slightly vs exact math because the softmax
    # normalization uses the TPU's approximate reciprocal (EUP).
    assert jnp.allclose(out, ref, atol=1e-2, rtol=1e-2), "mismatch vs reference"

    print("KERNEL_OK")
</pallas_src>

<mosaic_0001>
module attributes {stable_mosaic.version = 11 : i64} {
  func.func @_attention_kernel(%arg0: i32, %arg1: memref<1x8x32xf32, #tpu.memory_space<vmem>>, %arg2: memref<32x96xf32, #tpu.memory_space<vmem>>, %arg3: memref<32x32xf32, #tpu.memory_space<vmem>>, %arg4: memref<1x32xf32, #tpu.memory_space<vmem>>, %arg5: memref<1x8x32xf32, #tpu.memory_space<vmem>>) attributes {dimension_semantics = [#tpu.dimension_semantics<parallel>], iteration_bounds = array<i64: 2>, scalar_prefetch = 0 : i64, scratch_operands = 0 : i64, tpu.core_type = #tpu.core_type<tc>, window_params = [{transform_indices = @transform_0, window_bounds = array<i64: 1, 8, 32>}, {pipeline_mode = #tpu.pipeline_mode<synchronous>, transform_indices = @transform_1, window_bounds = array<i64: 32, 96>}, {pipeline_mode = #tpu.pipeline_mode<synchronous>, transform_indices = @transform_2, window_bounds = array<i64: 32, 32>}, {pipeline_mode = #tpu.pipeline_mode<synchronous>, transform_indices = @transform_3, window_bounds = array<i64: 1, 32>}, {transform_indices = @transform_4, window_bounds = array<i64: 1, 8, 32>}]} {
    %c0 = arith.constant 0 : index
    %c0_0 = arith.constant 0 : index
    %c0_1 = arith.constant 0 : index
    %0 = vector.load %arg1[%c0, %c0_0, %c0_1] : memref<1x8x32xf32, #tpu.memory_space<vmem>>, vector<1x8x32xf32>
    %1 = vector.shape_cast %0 : vector<1x8x32xf32> to vector<8x32xf32>
    %c0_2 = arith.constant 0 : index
    %c0_3 = arith.constant 0 : index
    %2 = vector.load %arg2[%c0_2, %c0_3] : memref<32x96xf32, #tpu.memory_space<vmem>>, vector<32x96xf32>
    %cst = arith.constant dense<0.000000e+00> : vector<8x96xf32>
    %3 = tpu.matmul %1, %2, %cst {dimension_numbers = #tpu.dot_dimension_numbers<[1], [0], [0], [1], [0, 0, 1, 1], [], []>} : vector<8x32xf32>, vector<32x96xf32>, vector<8x96xf32> -> vector<8x96xf32>
    %4 = vector.extract_strided_slice %3 {offsets = [0, 0], sizes = [8, 4], strides = [1, 1]} : vector<8x96xf32> to vector<8x4xf32>
    %cst_4 = arith.constant 5.000000e-01 : f32
    %5 = vector.broadcast %cst_4 : f32 to vector<8x4xf32>
    %6 = arith.mulf %4, %5 : vector<8x4xf32>
    %7 = vector.extract_strided_slice %3 {offsets = [0, 32], sizes = [8, 4], strides = [1, 1]} : vector<8x96xf32> to vector<8x4xf32>
    %8 = vector.extract_strided_slice %3 {offsets = [0, 64], sizes = [8, 4], strides = [1, 1]} : vector<8x96xf32> to vector<8x4xf32>
    %cst_5 = arith.constant dense<0.000000e+00> : vector<8x8xf32>
    %9 = tpu.matmul %6, %7, %cst_5 {dimension_numbers = #tpu.dot_dimension_numbers<[1], [1], [0], [0], [0, 0, 1, 0], [], []>} : vector<8x4xf32>, vector<8x4xf32>, vector<8x8xf32> -> vector<8x8xf32>
    %cst_6 = arith.constant dense<0xFF800000> : vector<8xf32>
    %10 = vector.multi_reduction <maximumf>, %9, %cst_6 [1] : vector<8x8xf32> to vector<8xf32>
    %11 = vector.shape_cast %10 : vector<8xf32> to vector<8x1xf32>
    %12 = vector.broadcast %11 : vector<8x1xf32> to vector<8x8xf32>
    %13 = arith.subf %9, %12 : vector<8x8xf32>
    %14 = math.exp %13 : vector<8x8xf32>
    %cst_7 = arith.constant dense<0.000000e+00> : vector<8xf32>
    %15 = vector.multi_reduction <add>, %14, %cst_7 [1] : vector<8x8xf32> to vector<8xf32>
    %16 = vector.shape_cast %15 : vector<8xf32> to vector<8x1xf32>
    %17 = tpu.reciprocal %16 {approx = true} : vector<8x1xf32> -> vector<8x1xf32>
    %18 = vector.broadcast %17 : vector<8x1xf32> to vector<8x8xf32>
    %19 = arith.mulf %14, %18 : vector<8x8xf32>
    %cst_8 = arith.constant dense<0.000000e+00> : vector<8x4xf32>
    %20 = tpu.matmul %19, %8, %cst_8 {dimension_numbers = #tpu.dot_dimension_numbers<[1], [0], [0], [1], [0, 0, 1, 1], [], []>} : vector<8x8xf32>, vector<8x4xf32>, vector<8x4xf32> -> vector<8x4xf32>
    %21 = vector.extract_strided_slice %3 {offsets = [0, 4], sizes = [8, 4], strides = [1, 1]} : vector<8x96xf32> to vector<8x4xf32>
    %cst_9 = arith.constant 5.000000e-01 : f32
    %22 = vector.broadcast %cst_9 : f32 to vector<8x4xf32>
    %23 = arith.mulf %21, %22 : vector<8x4xf32>
    %24 = vector.extract_strided_slice %3 {offsets = [0, 36], sizes = [8, 4], strides = [1, 1]} : vector<8x96xf32> to vector<8x4xf32>
    %25 = vector.extract_strided_slice %3 {offsets = [0, 68], sizes = [8, 4], strides = [1, 1]} : vector<8x96xf32> to vector<8x4xf32>
    %cst_10 = arith.constant dense<0.000000e+00> : vector<8x8xf32>
    %26 = tpu.matmul %23, %24, %cst_10 {dimension_numbers = #tpu.dot_dimension_numbers<[1], [1], [0], [0], [0, 0, 1, 0], [], []>} : vector<8x4xf32>, vector<8x4xf32>, vector<8x8xf32> -> vector<8x8xf32>
    %cst_11 = arith.constant dense<0xFF800000> : vector<8xf32>
    %27 = vector.multi_reduction <maximumf>, %26, %cst_11 [1] : vector<8x8xf32> to vector<8xf32>
    %28 = vector.shape_cast %27 : vector<8xf32> to vector<8x1xf32>
    %29 = vector.broadcast %28 : vector<8x1xf32> to vector<8x8xf32>
    %30 = arith.subf %26, %29 : vector<8x8xf32>
    %31 = math.exp %30 : vector<8x8xf32>
    %cst_12 = arith.constant dense<0.000000e+00> : vector<8xf32>
    %32 = vector.multi_reduction <add>, %31, %cst_12 [1] : vector<8x8xf32> to vector<8xf32>
    %33 = vector.shape_cast %32 : vector<8xf32> to vector<8x1xf32>
    %34 = tpu.reciprocal %33 {approx = true} : vector<8x1xf32> -> vector<8x1xf32>
    %35 = vector.broadcast %34 : vector<8x1xf32> to vector<8x8xf32>
    %36 = arith.mulf %31, %35 : vector<8x8xf32>
    %cst_13 = arith.constant dense<0.000000e+00> : vector<8x4xf32>
    %37 = tpu.matmul %36, %25, %cst_13 {dimension_numbers = #tpu.dot_dimension_numbers<[1], [0], [0], [1], [0, 0, 1, 1], [], []>} : vector<8x8xf32>, vector<8x4xf32>, vector<8x4xf32> -> vector<8x4xf32>
    %38 = vector.extract_strided_slice %3 {offsets = [0, 8], sizes = [8, 4], strides = [1, 1]} : vector<8x96xf32> to vector<8x4xf32>
    %cst_14 = arith.constant 5.000000e-01 : f32
    %39 = vector.broadcast %cst_14 : f32 to vector<8x4xf32>
    %40 = arith.mulf %38, %39 : vector<8x4xf32>
    %41 = vector.extract_strided_slice %3 {offsets = [0, 40], sizes = [8, 4], strides = [1, 1]} : vector<8x96xf32> to vector<8x4xf32>
    %42 = vector.extract_strided_slice %3 {offsets = [0, 72], sizes = [8, 4], strides = [1, 1]} : vector<8x96xf32> to vector<8x4xf32>
    %cst_15 = arith.constant dense<0.000000e+00> : vector<8x8xf32>
    %43 = tpu.matmul %40, %41, %cst_15 {dimension_numbers = #tpu.dot_dimension_numbers<[1], [1], [0], [0], [0, 0, 1, 0], [], []>} : vector<8x4xf32>, vector<8x4xf32>, vector<8x8xf32> -> vector<8x8xf32>
    %cst_16 = arith.constant dense<0xFF800000> : vector<8xf32>
    %44 = vector.multi_reduction <maximumf>, %43, %cst_16 [1] : vector<8x8xf32> to vector<8xf32>
    %45 = vector.shape_cast %44 : vector<8xf32> to vector<8x1xf32>
    %46 = vector.broadcast %45 : vector<8x1xf32> to vector<8x8xf32>
    %47 = arith.subf %43, %46 : vector<8x8xf32>
    %48 = math.exp %47 : vector<8x8xf32>
    %cst_17 = arith.constant dense<0.000000e+00> : vector<8xf32>
    %49 = vector.multi_reduction <add>, %48, %cst_17 [1] : vector<8x8xf32> to vector<8xf32>
    %50 = vector.shape_cast %49 : vector<8xf32> to vector<8x1xf32>
    %51 = tpu.reciprocal %50 {approx = true} : vector<8x1xf32> -> vector<8x1xf32>
    %52 = vector.broadcast %51 : vector<8x1xf32> to vector<8x8xf32>
    %53 = arith.mulf %48, %52 : vector<8x8xf32>
    %cst_18 = arith.constant dense<0.000000e+00> : vector<8x4xf32>
    %54 = tpu.matmul %53, %42, %cst_18 {dimension_numbers = #tpu.dot_dimension_numbers<[1], [0], [0], [1], [0, 0, 1, 1], [], []>} : vector<8x8xf32>, vector<8x4xf32>, vector<8x4xf32> -> vector<8x4xf32>
    %55 = vector.extract_strided_slice %3 {offsets = [0, 12], sizes = [8, 4], strides = [1, 1]} : vector<8x96xf32> to vector<8x4xf32>
    %cst_19 = arith.constant 5.000000e-01 : f32
    %56 = vector.broadcast %cst_19 : f32 to vector<8x4xf32>
    %57 = arith.mulf %55, %56 : vector<8x4xf32>
    %58 = vector.extract_strided_slice %3 {offsets = [0, 44], sizes = [8, 4], strides = [1, 1]} : vector<8x96xf32> to vector<8x4xf32>
    %59 = vector.extract_strided_slice %3 {offsets = [0, 76], sizes = [8, 4], strides = [1, 1]} : vector<8x96xf32> to vector<8x4xf32>
    %cst_20 = arith.constant dense<0.000000e+00> : vector<8x8xf32>
    %60 = tpu.matmul %57, %58, %cst_20 {dimension_numbers = #tpu.dot_dimension_numbers<[1], [1], [0], [0], [0, 0, 1, 0], [], []>} : vector<8x4xf32>, vector<8x4xf32>, vector<8x8xf32> -> vector<8x8xf32>
    %cst_21 = arith.constant dense<0xFF800000> : vector<8xf32>
    %61 = vector.multi_reduction <maximumf>, %60, %cst_21 [1] : vector<8x8xf32> to vector<8xf32>
    %62 = vector.shape_cast %61 : vector<8xf32> to vector<8x1xf32>
    %63 = vector.broadcast %62 : vector<8x1xf32> to vector<8x8xf32>
    %64 = arith.subf %60, %63 : vector<8x8xf32>
    %65 = math.exp %64 : vector<8x8xf32>
    %cst_22 = arith.constant dense<0.000000e+00> : vector<8xf32>
    %66 = vector.multi_reduction <add>, %65, %cst_22 [1] : vector<8x8xf32> to vector<8xf32>
    %67 = vector.shape_cast %66 : vector<8xf32> to vector<8x1xf32>
    %68 = tpu.reciprocal %67 {approx = true} : vector<8x1xf32> -> vector<8x1xf32>
    %69 = vector.broadcast %68 : vector<8x1xf32> to vector<8x8xf32>
    %70 = arith.mulf %65, %69 : vector<8x8xf32>
    %cst_23 = arith.constant dense<0.000000e+00> : vector<8x4xf32>
    %71 = tpu.matmul %70, %59, %cst_23 {dimension_numbers = #tpu.dot_dimension_numbers<[1], [0], [0], [1], [0, 0, 1, 1], [], []>} : vector<8x8xf32>, vector<8x4xf32>, vector<8x4xf32> -> vector<8x4xf32>
    %72 = vector.extract_strided_slice %3 {offsets = [0, 16], sizes = [8, 4], strides = [1, 1]} : vector<8x96xf32> to vector<8x4xf32>
    %cst_24 = arith.constant 5.000000e-01 : f32
    %73 = vector.broadcast %cst_24 : f32 to vector<8x4xf32>
    %74 = arith.mulf %72, %73 : vector<8x4xf32>
    %75 = vector.extract_strided_slice %3 {offsets = [0, 48], sizes = [8, 4], strides = [1, 1]} : vector<8x96xf32> to vector<8x4xf32>
    %76 = vector.extract_strided_slice %3 {offsets = [0, 80], sizes = [8, 4], strides = [1, 1]} : vector<8x96xf32> to vector<8x4xf32>
    %cst_25 = arith.constant dense<0.000000e+00> : vector<8x8xf32>
    %77 = tpu.matmul %74, %75, %cst_25 {dimension_numbers = #tpu.dot_dimension_numbers<[1], [1], [0], [0], [0, 0, 1, 0], [], []>} : vector<8x4xf32>, vector<8x4xf32>, vector<8x8xf32> -> vector<8x8xf32>
    %cst_26 = arith.constant dense<0xFF800000> : vector<8xf32>
    %78 = vector.multi_reduction <maximumf>, %77, %cst_26 [1] : vector<8x8xf32> to vector<8xf32>
    %79 = vector.shape_cast %78 : vector<8xf32> to vector<8x1xf32>
    %80 = vector.broadcast %79 : vector<8x1xf32> to vector<8x8xf32>
    %81 = arith.subf %77, %80 : vector<8x8xf32>
    %82 = math.exp %81 : vector<8x8xf32>
    %cst_27 = arith.constant dense<0.000000e+00> : vector<8xf32>
    %83 = vector.multi_reduction <add>, %82, %cst_27 [1] : vector<8x8xf32> to vector<8xf32>
    %84 = vector.shape_cast %83 : vector<8xf32> to vector<8x1xf32>
    %85 = tpu.reciprocal %84 {approx = true} : vector<8x1xf32> -> vector<8x1xf32>
    %86 = vector.broadcast %85 : vector<8x1xf32> to vector<8x8xf32>
    %87 = arith.mulf %82, %86 : vector<8x8xf32>
    %cst_28 = arith.constant dense<0.000000e+00> : vector<8x4xf32>
    %88 = tpu.matmul %87, %76, %cst_28 {dimension_numbers = #tpu.dot_dimension_numbers<[1], [0], [0], [1], [0, 0, 1, 1], [], []>} : vector<8x8xf32>, vector<8x4xf32>, vector<8x4xf32> -> vector<8x4xf32>
    %89 = vector.extract_strided_slice %3 {offsets = [0, 20], sizes = [8, 4], strides = [1, 1]} : vector<8x96xf32> to vector<8x4xf32>
    %cst_29 = arith.constant 5.000000e-01 : f32
    %90 = vector.broadcast %cst_29 : f32 to vector<8x4xf32>
    %91 = arith.mulf %89, %90 : vector<8x4xf32>
    %92 = vector.extract_strided_slice %3 {offsets = [0, 52], sizes = [8, 4], strides = [1, 1]} : vector<8x96xf32> to vector<8x4xf32>
    %93 = vector.extract_strided_slice %3 {offsets = [0, 84], sizes = [8, 4], strides = [1, 1]} : vector<8x96xf32> to vector<8x4xf32>
    %cst_30 = arith.constant dense<0.000000e+00> : vector<8x8xf32>
    %94 = tpu.matmul %91, %92, %cst_30 {dimension_numbers = #tpu.dot_dimension_numbers<[1], [1], [0], [0], [0, 0, 1, 0], [], []>} : vector<8x4xf32>, vector<8x4xf32>, vector<8x8xf32> -> vector<8x8xf32>
    %cst_31 = arith.constant dense<0xFF800000> : vector<8xf32>
    %95 = vector.multi_reduction <maximumf>, %94, %cst_31 [1] : vector<8x8xf32> to vector<8xf32>
    %96 = vector.shape_cast %95 : vector<8xf32> to vector<8x1xf32>
    %97 = vector.broadcast %96 : vector<8x1xf32> to vector<8x8xf32>
    %98 = arith.subf %94, %97 : vector<8x8xf32>
    %99 = math.exp %98 : vector<8x8xf32>
    %cst_32 = arith.constant dense<0.000000e+00> : vector<8xf32>
    %100 = vector.multi_reduction <add>, %99, %cst_32 [1] : vector<8x8xf32> to vector<8xf32>
    %101 = vector.shape_cast %100 : vector<8xf32> to vector<8x1xf32>
    %102 = tpu.reciprocal %101 {approx = true} : vector<8x1xf32> -> vector<8x1xf32>
    %103 = vector.broadcast %102 : vector<8x1xf32> to vector<8x8xf32>
    %104 = arith.mulf %99, %103 : vector<8x8xf32>
    %cst_33 = arith.constant dense<0.000000e+00> : vector<8x4xf32>
    %105 = tpu.matmul %104, %93, %cst_33 {dimension_numbers = #tpu.dot_dimension_numbers<[1], [0], [0], [1], [0, 0, 1, 1], [], []>} : vector<8x8xf32>, vector<8x4xf32>, vector<8x4xf32> -> vector<8x4xf32>
    %106 = vector.extract_strided_slice %3 {offsets = [0, 24], sizes = [8, 4], strides = [1, 1]} : vector<8x96xf32> to vector<8x4xf32>
    %cst_34 = arith.constant 5.000000e-01 : f32
    %107 = vector.broadcast %cst_34 : f32 to vector<8x4xf32>
    %108 = arith.mulf %106, %107 : vector<8x4xf32>
    %109 = vector.extract_strided_slice %3 {offsets = [0, 56], sizes = [8, 4], strides = [1, 1]} : vector<8x96xf32> to vector<8x4xf32>
    %110 = vector.extract_strided_slice %3 {offsets = [0, 88], sizes = [8, 4], strides = [1, 1]} : vector<8x96xf32> to vector<8x4xf32>
    %cst_35 = arith.constant dense<0.000000e+00> : vector<8x8xf32>
    %111 = tpu.matmul %108, %109, %cst_35 {dimension_numbers = #tpu.dot_dimension_numbers<[1], [1], [0], [0], [0, 0, 1, 0], [], []>} : vector<8x4xf32>, vector<8x4xf32>, vector<8x8xf32> -> vector<8x8xf32>
    %cst_36 = arith.constant dense<0xFF800000> : vector<8xf32>
    %112 = vector.multi_reduction <maximumf>, %111, %cst_36 [1] : vector<8x8xf32> to vector<8xf32>
    %113 = vector.shape_cast %112 : vector<8xf32> to vector<8x1xf32>
    %114 = vector.broadcast %113 : vector<8x1xf32> to vector<8x8xf32>
    %115 = arith.subf %111, %114 : vector<8x8xf32>
    %116 = math.exp %115 : vector<8x8xf32>
    %cst_37 = arith.constant dense<0.000000e+00> : vector<8xf32>
    %117 = vector.multi_reduction <add>, %116, %cst_37 [1] : vector<8x8xf32> to vector<8xf32>
    %118 = vector.shape_cast %117 : vector<8xf32> to vector<8x1xf32>
    %119 = tpu.reciprocal %118 {approx = true} : vector<8x1xf32> -> vector<8x1xf32>
    %120 = vector.broadcast %119 : vector<8x1xf32> to vector<8x8xf32>
    %121 = arith.mulf %116, %120 : vector<8x8xf32>
    %cst_38 = arith.constant dense<0.000000e+00> : vector<8x4xf32>
    %122 = tpu.matmul %121, %110, %cst_38 {dimension_numbers = #tpu.dot_dimension_numbers<[1], [0], [0], [1], [0, 0, 1, 1], [], []>} : vector<8x8xf32>, vector<8x4xf32>, vector<8x4xf32> -> vector<8x4xf32>
    %123 = vector.extract_strided_slice %3 {offsets = [0, 28], sizes = [8, 4], strides = [1, 1]} : vector<8x96xf32> to vector<8x4xf32>
    %cst_39 = arith.constant 5.000000e-01 : f32
    %124 = vector.broadcast %cst_39 : f32 to vector<8x4xf32>
    %125 = arith.mulf %123, %124 : vector<8x4xf32>
    %126 = vector.extract_strided_slice %3 {offsets = [0, 60], sizes = [8, 4], strides = [1, 1]} : vector<8x96xf32> to vector<8x4xf32>
    %127 = vector.extract_strided_slice %3 {offsets = [0, 92], sizes = [8, 4], strides = [1, 1]} : vector<8x96xf32> to vector<8x4xf32>
    %cst_40 = arith.constant dense<0.000000e+00> : vector<8x8xf32>
    %128 = tpu.matmul %125, %126, %cst_40 {dimension_numbers = #tpu.dot_dimension_numbers<[1], [1], [0], [0], [0, 0, 1, 0], [], []>} : vector<8x4xf32>, vector<8x4xf32>, vector<8x8xf32> -> vector<8x8xf32>
    %cst_41 = arith.constant dense<0xFF800000> : vector<8xf32>
    %129 = vector.multi_reduction <maximumf>, %128, %cst_41 [1] : vector<8x8xf32> to vector<8xf32>
    %130 = vector.shape_cast %129 : vector<8xf32> to vector<8x1xf32>
    %131 = vector.broadcast %130 : vector<8x1xf32> to vector<8x8xf32>
    %132 = arith.subf %128, %131 : vector<8x8xf32>
    %133 = math.exp %132 : vector<8x8xf32>
    %cst_42 = arith.constant dense<0.000000e+00> : vector<8xf32>
    %134 = vector.multi_reduction <add>, %133, %cst_42 [1] : vector<8x8xf32> to vector<8xf32>
    %135 = vector.shape_cast %134 : vector<8xf32> to vector<8x1xf32>
    %136 = tpu.reciprocal %135 {approx = true} : vector<8x1xf32> -> vector<8x1xf32>
    %137 = vector.broadcast %136 : vector<8x1xf32> to vector<8x8xf32>
    %138 = arith.mulf %133, %137 : vector<8x8xf32>
    %cst_43 = arith.constant dense<0.000000e+00> : vector<8x4xf32>
    %139 = tpu.matmul %138, %127, %cst_43 {dimension_numbers = #tpu.dot_dimension_numbers<[1], [0], [0], [1], [0, 0, 1, 1], [], []>} : vector<8x8xf32>, vector<8x4xf32>, vector<8x4xf32> -> vector<8x4xf32>
    %140 = tpu.concatenate %20, %37, %54, %71, %88, %105, %122, %139 in 1 : vector<8x4xf32>, vector<8x4xf32>, vector<8x4xf32>, vector<8x4xf32>, vector<8x4xf32>, vector<8x4xf32>, vector<8x4xf32>, vector<8x4xf32> -> vector<8x32xf32>
    %c0_44 = arith.constant 0 : index
    %c0_45 = arith.constant 0 : index
    %141 = vector.load %arg3[%c0_44, %c0_45] : memref<32x32xf32, #tpu.memory_space<vmem>>, vector<32x32xf32>
    %cst_46 = arith.constant dense<0.000000e+00> : vector<8x32xf32>
    %142 = tpu.matmul %140, %141, %cst_46 {dimension_numbers = #tpu.dot_dimension_numbers<[1], [0], [0], [1], [0, 0, 1, 1], [], []>} : vector<8x32xf32>, vector<32x32xf32>, vector<8x32xf32> -> vector<8x32xf32>
    %c0_47 = arith.constant 0 : index
    %c0_48 = arith.constant 0 : index
    %143 = vector.load %arg4[%c0_47, %c0_48] : memref<1x32xf32, #tpu.memory_space<vmem>>, vector<1x32xf32>
    %144 = vector.broadcast %143 : vector<1x32xf32> to vector<8x32xf32>
    %145 = arith.addf %142, %144 : vector<8x32xf32>
    %c0_49 = arith.constant 0 : index
    %c0_50 = arith.constant 0 : index
    %c0_51 = arith.constant 0 : index
    %146 = vector.load %arg5[%c0_49, %c0_50, %c0_51] : memref<1x8x32xf32, #tpu.memory_space<vmem>>, vector<1x8x32xf32>
    %147 = vector.shape_cast %146 : vector<1x8x32xf32> to vector<8x32xf32>
    %148 = vector.shape_cast %145 : vector<8x32xf32> to vector<1x8x32xf32>
    tpu.vector_store %arg5[%c0_49, %c0_50, %c0_51], %148 {strides = array<i32>} : memref<1x8x32xf32, #tpu.memory_space<vmem>>, vector<1x8x32xf32>,
    return
  }
  func.func @transform_0(%arg0: i32) -> (i32, i32, i32) {
    %c0_i32 = arith.constant 0 : i32
    %c0_i32_0 = arith.constant 0 : i32
    %c0_i32_1 = arith.constant 0 : i32
    return %arg0, %c0_i32, %c0_i32_0 : i32, i32, i32
  }
  func.func @transform_1(%arg0: i32) -> (i32, i32) {
    %c0_i32 = arith.constant 0 : i32
    %c0_i32_0 = arith.constant 0 : i32
    %c0_i32_1 = arith.constant 0 : i32
    return %c0_i32, %c0_i32_0 : i32, i32
  }
  func.func @transform_2(%arg0: i32) -> (i32, i32) {
    %c0_i32 = arith.constant 0 : i32
    %c0_i32_0 = arith.constant 0 : i32
    %c0_i32_1 = arith.constant 0 : i32
    return %c0_i32, %c0_i32_0 : i32, i32
  }
  func.func @transform_3(%arg0: i32) -> (i32, i32) {
    %c0_i32 = arith.constant 0 : i32
    %c0_i32_0 = arith.constant 0 : i32
    %c0_i32_1 = arith.constant 0 : i32
    return %c0_i32, %c0_i32_0 : i32, i32
  }
  func.func @transform_4(%arg0: i32) -> (i32, i32, i32) {
    %c0_i32 = arith.constant 0 : i32
    %c0_i32_0 = arith.constant 0 : i32
    %c0_i32_1 = arith.constant 0 : i32
    return %arg0, %c0_i32, %c0_i32_0 : i32, i32, i32
  }
}

</mosaic_0001>

<bundles_post_ra>
// kernel: tpu_custom_call.1
= control target key start
LH: loop header
LB: loop body
LE: loop exit
PB: predicated region body
PF: predicated region fallthrough
CT: control target
= control target key end

     0   :  { %9 = vsyncpa [#allocation3], 0  ;;  %s2744_s0 = inlined_call_operand.hbm [shape: f32[2,8,32], index: 0, kind: input, shape index: {}]   ;;  %s2745_s1 = inlined_call_operand.hbm [shape: f32[32,96], index: 1, kind: input, shape index: {}]   ;;  %s2746_s2 = inlined_call_operand.hbm [shape: f32[32,32], index: 2, kind: input, shape index: {}]   ;;  %s2747_s3 = inlined_call_operand.vmem [shape: f32[1,32], index: 3, kind: input, shape index: {}]   ;;  %s2748_s4 = inlined_call_operand.hbm [shape: f32[2,8,32], index: 4, kind: output, shape index: {}]  }
   0x1   :  { %11 = vsyncpa [#allocation3 + $0x1], 0 }
   0x2   :  { %12 = vsyncpa [#allocation6], 0 }
   0x3   :  { %13 = vsyncpa [#allocation4], 0 }
   0x4   :  { %15 = vsyncpa [#allocation4 + $0x1], 0  ;;  %s2405_s15 = smov 0   ;;  %s2407_s16 = smov 0  }
   0x5   :  { %s2409_s17 = smov 0   ;;  %s2411_s18 = smov 0  }
   0x6 LB: > { %s2426_s19 = sadd.s32 4294967295, %s2340_s18   ;;  %s1872_s20 = sadd.s32 4294967294, %s2340_s18   ;;  %s2340_s18 = sphi %s2411_s18, %s2770_s18   ;;  %s2336_s17 = sphi %s2409_s17, %s2769_s17   ;;  %s2332_s16 = sphi %s2407_s16, %s2768_s16   ;;  %s2328_s15 = sphi %s2405_s15, %s2767_s15  }
   0x7   : > { %p41_p0 = scmp.ne.s32.totalorder %s2332_s16, %s2328_s15  ;;  %p2749_p1 = scmp.eq.s32.totalorder %s2426_s19, 0 }
   0x8   : > { %p134_p3 = scmp.eq.s32.totalorder %s1872_s20, 1  ;;  %p1873_p5 = scmp.ge.s32.totalorder %s2340_s18, 1 }
   0x9   : > { %p2435_p4 = por %p2749_p1, %p41_p0  ;;  %p141_p7 = scmp.lt.s32.totalorder %s2340_s18, 3 }
   0xa   : > { %p2440_p6 = por %p134_p3, %p41_p0  ;;  %s2342_s24 = smov [#allocation5]  }
   0xb   : > { %s2753_s21 = scalar_select %p2435_p4, 1, 0 }
   0xc   : > { %s2754_s22 = scalar_select %p2440_p6, 1, 0 }
   0xd   : > { %p2445_p8 = pnand %p1873_p5, %p141_p7  ;;  %s153_s25 = sshll.u32 %s2342_s24, 4  ;;  %s154_s25 = int_to_ptr.vmem [resolvable:$true] %s153_s25 }
   0xe   : > { %s2343_s27 = smov [#allocation7]   ;;  %s2203_s29 = scalar_lea.vmem %s154_s25, 512 }
   0xf   : > { %s2755_s23 = scalar_select %p2445_p8, 1, 0 }
  0x10   : > { %p2071_p9 = pneg %p2445_p8  ;;  %s166_s28 = sshll.u32 %s2343_s27, 4  ;;  %s167_s28 = int_to_ptr.vmem [resolvable:$true] %s166_s28 }
  0x11   : > { %p2204_p13 = scmp.ne.s32.totalorder %s154_s25, %s2203_s29  ;;  %p2211_p5 = scmp.lt.s32.totalorder %s154_s25, %s154_s25 }
  0x12   : > { %p2454_p11 = pnand %p2071_p9, %p2749_p1  ;;  %p2212_p7 = scmp.lt.s32.totalorder %s2203_s29, %s2203_s29 }
  0x14   : > { %p2194_p12 = pneg %p2454_p11  ;;  %p2213_p10 = por %p2212_p7, %p2211_p5 }
  0x16   : > { %p2206_p0 = pnand %p2204_p13, %p2194_p12 }
  0x18   : > { %p2207_p3 = pneg %p2206_p0 }
  0x1a   : > { %p2214_p9 = pnand %p2213_p10, %p2207_p3 }
  0x1c   : > { %2217 = shalt.err (!%p2214_p9)
}
  0x1d   : > { %s2344_s30 = smov 128   ;;  %s2345_s5 = smov 8  }
  0x1e   : > { %2074 = dma.hbm_to_vmem [thread:$0]  (!%p2454_p11), %s2745_s1, 512, %s154_s25, [#allocation6], %s2344_s30, %s2344_s30, %s2345_s5  }
  0x1f   : > { %s2229_s8 = scalar_lea.vmem %s167_s28, 512  ;;  %p2237_p2 = scmp.lt.s32.totalorder %s167_s28, %s167_s28 }
  0x20   : > { %p2230_p1 = scmp.ne.s32.totalorder %s167_s28, %s2229_s8  ;;  %p2238_p6 = scmp.lt.s32.totalorder %s2229_s8, %s2229_s8 }
  0x22   : > { %p2232_p13 = pnand %p2230_p1, %p2194_p12  ;;  %p2239_p5 = por %p2238_p6, %p2237_p2 }
  0x24   : > { %p2233_p0 = pneg %p2232_p13 }
  0x26   : > { %p2240_p10 = pnand %p2239_p5, %p2233_p0 }
  0x28   : > { %2243 = shalt.err (!%p2240_p10)
}
  0x29   : > { %2077 = dma.hbm_to_vmem [thread:$0]  (!%p2454_p11), %s2746_s2, 512, %s167_s28, [#allocation6], %s2344_s30, %s2344_s30, %s2345_s5  }
  0x2a   : > { %s2477_s11 = sadd.s32 1, %s2340_s18   ;;  %s28_s12 = sadd.s32 1, %s2336_s17 }
  0x2b   : > { %s25_s13 = ssub.s32 %s2340_s18, %s2477_s11  ;;  %p35_p1 = scmp.ne.s32.totalorder %s2336_s17, %s2332_s16 }
  0x2c   : > { %p26_p2 = scmp.eq.s32.totalorder %s25_s13, 0  ;;  %p36_p6 = scmp.eq.s32.totalorder %s2340_s18, 0 }
  0x2d   : > { %p2757_p12 = scmp.eq.s32.totalorder %s2426_s19, 1  ;;  %p2088_p7 = scmp.lt.s32.totalorder %s2340_s18, 2 }
  0x2e   : > { %s2493_s20 = scalar_select %p26_p2, %s2336_s17, %s28_s12  }
  0x2f   : > { %p2487_p3 = por %p2757_p12, %p35_p1  ;;  %p37_p9 = por %p36_p6, %p35_p1 }
  0x30   : > { %s183_s24 = sand.u32 1, %s2336_s17   ;;  %s1878_s26 = sshll.u32 %s2340_s18, 7 }
  0x31   : > { %s2758_s14 = scalar_select %p2487_p3, 1, 0 }
  0x32   : > { %s1877_s25 = sshll.u32 %s183_s24, 3  ;;  %s2500_s29 = scalar_lea.hbm %s2744_s0, %s1878_s26 }
  0x33   : > { %s187_s30 = scalar_lea.vmem [#allocation2], %s1877_s25  ;;  %p2502_p11 = pnand %p2088_p7, %p37_p9 }
  0x34   : > { %s194_s5 = sshll.u32 %s187_s30, 4  ;;  %s184_s7 = scalar_lea.sflag [#allocation3], %s183_s24  ;;  %s195_s5 = int_to_ptr.vmem [resolvable:$true] %s194_s5 }
  0x35   : > { %s2244_s8 = scalar_lea.hbm %s2500_s29, 128  ;;  %p2246_p0 = pneg %p2502_p11 }
  0x36   : > { %p2245_p13 = scmp.ne.s32.totalorder %s2500_s29, %s2244_s8  ;;  %s2249_s12 = scalar_lea.hbm %s2744_s0, 256 }
  0x37   : > { %p2250_p1 = scmp.lt.s32.totalorder %s2500_s29, %s2744_s0  ;;  %p2251_p2 = scmp.lt.s32.totalorder %s2249_s12, %s2244_s8 }
  0x38   : > { %p2247_p5 = pnand %p2246_p0, %p2245_p13 }
  0x39   : > { %p2252_p6 = por %p2251_p2, %p2250_p1 }
  0x3a   : > { %p2248_p10 = pneg %p2247_p5 }
  0x3c   : > { %p2253_p12 = pnand %p2252_p6, %p2248_p10 }
  0x3e   : > { %2256 = shalt.err (!%p2253_p12)
}
  0x3f   : > { %s2257_s26 = scalar_lea.vmem %s195_s5, 128  ;;  %s2346_s24 = smov [#allocation2]  }
  0x40   : > { %p2258_p7 = scmp.ne.s32.totalorder %s195_s5, %s2257_s26  ;;  %s2262_s27 = sshll.u32 %s2346_s24, 4  ;;  %s2263_s27 = int_to_ptr.vmem [resolvable:$false] %s2262_s27 }
  0x41   : > { %s2264_s28 = scalar_lea.vmem %s2263_s27, 256  ;;  %p2265_p13 = scmp.lt.s32.totalorder %s195_s5, %s2263_s27 }
  0x42   : > { %p2260_p9 = pnand %p2258_p7, %p2246_p0  ;;  %p2266_p5 = scmp.lt.s32.totalorder %s2264_s28, %s2257_s26 }
  0x44   : > { %p2261_p3 = pneg %p2260_p9  ;;  %p2267_p4 = por %p2266_p5, %p2265_p13 }
  0x46   : > { %p2268_p8 = pnand %p2267_p4, %p2261_p3 }
  0x48   : > { %2271 = shalt.err (!%p2268_p8)
}
  0x49   : > { %2081 = dma.hbm_to_vmem [thread:$0]  (!%p2502_p11), %s2500_s29, 128, %s195_s5, %s184_s7  }
  0x4a   : > { %p2760_p10 = scmp.ne.s32.totalorder %s2755_s23, 0 }
  0x4b   : > { %s2523_s30 = sand.u32 (!%p2760_p10), 1, %s2332_s16   ;;  %p2761_p4 = scmp.ne.s32.totalorder (!%p2760_p10), %s2753_s21, 0 }
  0x4c   : > { %203 = sbr.rel (%p2760_p10) target bundleno = 1977 (0x7b9), region = 36  ;;  %s1880_s8 = sshll.u32 (!%p2760_p10), %s2523_s30, 3 }
  0x4d   : > { %s206_s9 = scalar_lea.sflag (!%p2760_p10), [#allocation3], %s2523_s30  ;;  %s209_s10 = scalar_lea.vmem (!%p2760_p10), [#allocation2], %s1880_s8 }
  0x51   : > { %2315 = dma.done.wait (%p2761_p4), %s206_s9, 128  }
  0x52   : > { %2317 = vsyncadd (%p2761_p4), %s206_s9, 4294967168  ;;  %p2762_p8 = scmp.eq.s32.totalorder %s2426_s19, 0 }
  0x54   : > { %2319 = dma.done.wait (%p2762_p8), [#allocation6], 1024   ;;  %p2763_p3 = pmov %p2762_p8 }
  0x55   : > { %v2347_v0 = vmov 0.0   ;;  %vm2348_vm0 = vmmov 0   ;;  %v246_v1 = vld [vmem:[#allocation5 + $0x18] sm:$0xff]  ;;  %v245_v2 = vld [vmem:[#allocation5 + $0x10] sm:$0xff]  ;;  %v244_v3 = vld [vmem:[#allocation5 + $0x8] sm:$0xff]  ;;  %vm247_vm1 = vcmask 261120  }
  0x56   : > { %2321 = vsyncadd (%p2763_p3), [#allocation6], 4294966272  ;;  %1957 = vmatprep.subr.mxu0 %v2347_v0  ;;  %1965 = vmatprep.mubr.msk.f32.mxu0 %vm2348_vm0, %v2347_v0  ;;  %v243_v4 = vld [vmem:[#allocation5] sm:$0xff]  ;;  %v242_v5 = vld [vmem:[%s209_s10] sm:$0xff]  ;;  %s2349_s21 = smov 64   ;;  %s2350_s23 = smov 96  }
  0x57   : > { %1968 = vmatprep.subr.mxu1 %v2347_v0  ;;  %1970 = vmatprep.mubr.msk.f32.mxu1 %vm2348_vm0, %v2347_v0  ;;  %s2351_s29 = smov 92   ;;  %s2352_s5 = smov 124   ;;  %vm325_vm2 = vcmask 31744   ;;  %vm401_vm3 = vcmask 64512   ;;  %vm1674_vm4 = vcmask 97280   ;;  %vm1676_vm5 = vcmask 130048  }
  0x58   : > { %1958 = vmatpush3.msra.mxu0 %v246_v1  ;;  %s2353_s6 = smov 88   ;;  %s2354_s7 = smov 120   ;;  %vm1678_vm6 = vcmask 162816   ;;  %vm1680_vm7 = vcmask 195584   ;;  %vm1682_vm8 = vcmask 228352  }
  0x59   : > { %1959 = vmatprep.subr.mxu0 %v2347_v0  ;;  %s2355_s12 = smov 116   ;;  %s2356_s13 = smov 84  }
  0x5a   : > { %1960 = vmatpush3.msra.mxu0 %v245_v2  ;;  %s2357_s25 = smov 72   ;;  %s2358_s26 = smov 68  }
  0x5b   : > { %1961 = vmatprep.subr.mxu0 %v2347_v0  ;;  %s2359_s24 = smov 80   ;;  %s2360_s27 = smov 112  }
  0x5c   : > { %1962 = vmatpush3.msra.mxu0 %v244_v3  ;;  %s2361_s28 = smov 76   ;;  %s2362_s9 = smov 108  }
  0x5d   : > { %1963 = vmatprep.subr.mxu0 %v2347_v0  ;;  %s2363_s10 = smov 104   ;;  %p2764_p0 = scmp.ne.s32.totalorder %s2758_s14, 0 }
  0x5e   : > { %1964 = vmatpush3.msra.mxu0 %v243_v4 }
  0x5f   : > { %1966 = vmatmul.mubr.msk.f32.vlgmr.msra.gmra.mxu0 %vm247_vm1, %v242_v5  ;;  %1988 = vmatprep.subr.mxu0 %v2347_v0 }
  0x60   : > { %1990 = vmatprep.mubr.msk.f32.mxu0 %vm2348_vm0, %v2347_v0 }
 0x11f   : > { %v2550_v6 = vpop.f32.mrf.mxu0 }
 0x120   : > { %413 = vrot.lane.b32.xlu1 %v2550_v6, %s2349_s21  ;;  %323 = vrot.lane.b32.xlu0 %v2550_v6, %s2350_s23  ;;  %v321_v8 = vmul.f32 0.5, %v2550_v6  ;;  %s2364_s21 = smov 100   ;;  %s2365_s23 = smov 60  }
 0x121   : > { %v1967_v7 = vpop.f32.mrf.mxu0 }
 0x124   : > { %491 = vrot.lane.b32.xlu1 %v2550_v6, %s2351_s29  ;;  %s2366_s29 = smov 52  }
 0x128   : > { %489 = vrot.lane.b32.xlu1 %v321_v8, %s2352_s5  ;;  %s2367_s5 = smov 48  }
 0x12c   : > { %656 = vrot.lane.b32.xlu1 %v2550_v6, %s2353_s6  ;;  %s2368_s6 = smov 56  }
 0x130   : > { %654 = vrot.lane.b32.xlu1 %v321_v8, %s2354_s7  ;;  %s2369_s7 = smov 40  }
 0x134   : > { %819 = vrot.lane.b32.xlu1 %v321_v8, %s2355_s12  ;;  %s2370_s12 = smov 44  }
 0x192   : > { %v414_v9 = vpop.permute.xlu1 %413  ;;  %v324_v10 = vpop.permute.xlu0 %323 }
 0x193   : > { %1969 = vmatpush3.xpose.msk.msra.mxu1 %vm325_vm2, %v324_v10 }
 0x194   : > { %1973 = vmatprep.subr.mxu1 %v2347_v0 }
 0x196   : > { %v2559_v11 = vpop.permute.xlu1 %491  ;;  %1971 = vmatmul.mubr.msk.f32.vlgmr.msra.gmra.mxu1 %vm325_vm2, %v321_v8 }
 0x197   : > { %1974 = vmatpush3.msra.mxu1 %v414_v9  ;;  %1975 = vmatprep.mubr.msk.f32.mxu1 %vm2348_vm0, %v2347_v0 }
 0x198   : > { %1978 = vmatprep.subr.mxu1 %v2347_v0 }
 0x19a   : > { %v2565_v12 = vpop.permute.xlu1 %489 }
 0x19e   : > { %v657_v13 = vpop.permute.xlu1 %656 }
 0x19f   : > { %1989 = vmatpush3.xpose.msk.msra.mxu0 %vm325_vm2, %v657_v13 }
 0x1a0   : > { %1998 = vmatprep.subr.mxu0 %v2347_v0 }
 0x1a2   : > { %v655_v14 = vpop.permute.xlu1 %654 }
 0x1a3   : > { %1991 = vmatmul.mubr.msk.f32.vlgmr.msra.gmra.mxu0 %vm325_vm2, %v655_v14 }
 0x1a4   : > { %2000 = vmatprep.mubr.msk.f32.mxu0 %vm2348_vm0, %v2347_v0 }
 0x1a6   : > { %v820_v24 = vpop.permute.xlu1 %819 }
 0x256   : > { %v397_v15 = vpop.f32.mrf.mxu1 }
 0x257   : > { %v402_v16 = vsel %vm401_vm3, %v397_v15, -inf }
 0x258   : > { %403 = vmax.xlane.f32.xlu0 %v402_v16  ;;  %v1972_v17 = vpop.f32.mrf.mxu1 }
 0x263   : > { %v2573_v18 = vpop.f32.mrf.mxu0 }
 0x264   : > { %v732_v27 = vsel %vm401_vm3, %v2573_v18, -inf }
 0x265   : > { %v1992_v19 = vpop.f32.mrf.mxu0 }
 0x26e   : > { %821 = vrot.lane.b32.xlu0 %v2550_v6, %s2356_s13  ;;  %s2371_s13 = smov 36  }
 0x272   : > { %1316 = vrot.lane.b32.xlu0 %v2550_v6, %s2357_s25  ;;  %s2372_s25 = smov 4  }
 0x276   : > { %1481 = vrot.lane.b32.xlu0 %v2550_v6, %s2358_s26  ;;  %s2373_s26 = smov 8  }
 0x2e1   : > { %v404_v20 = vpop.xlane.xlu0 %403 }
 0x2e2   : > { %v405_v21 = vsub.f32 %v397_v15, %v404_v20 }
 0x2e4   : > { %v406_v22 = vmul.f32 1.442695, %v405_v21 }
 0x2e5   : > { %v822_v23 = vpop.permute.xlu0 %821 }
 0x2e6   : > { %2160 = vpow2.f32 %v406_v22  ;;  %1999 = vmatpush3.xpose.msk.msra.mxu0 %vm325_vm2, %v822_v23 }
 0x2e7   : > { %2008 = vmatprep.subr.mxu0 %v2347_v0 }
 0x2e9   : > { %2001 = vmatmul.mubr.msk.f32.vlgmr.msra.gmra.mxu0 %vm325_vm2, %v820_v24  ;;  %v1317_v33 = vpop.permute.xlu0 %1316 }
 0x2ea   : > { %2010 = vmatprep.mubr.msk.f32.mxu0 %vm2348_vm0, %v2347_v0 }
 0x2ed   : > { %v1482_v37 = vpop.permute.xlu0 %1481 }
 0x2f3   : > { %v2161_v25 = vpop.eup %2160 }
 0x2f4   : > { %v408_v26 = vsel %vm401_vm3, %v2161_v25, 0.0 }
 0x2f5   : > { %409 = vadd.xlane.f32.xlu1 %v408_v26 }
 0x306   : > { %986 = vrot.lane.b32.xlu1 %v2550_v6, %s2359_s24  ;;  %s2374_s24 = smov 12  }
 0x30a   : > { %984 = vrot.lane.b32.xlu1 %v321_v8, %s2360_s27  ;;  %s2375_s27 = smov 16  }
 0x30e   : > { %1151 = vrot.lane.b32.xlu1 %v2550_v6, %s2361_s28  ;;  %s2376_s28 = smov 20  }
 0x312   : > { %1149 = vrot.lane.b32.xlu1 %v321_v8, %s2362_s9  ;;  %s2377_s9 = smov 24  }
 0x316   : > { %1314 = vrot.lane.b32.xlu1 %v321_v8, %s2363_s10  ;;  %s2378_s10 = smov 28  }
 0x31a   : > { %1479 = vrot.lane.b32.xlu1 %v321_v8, %s2364_s21 }
 0x33e   : > { %733 = vmax.xlane.f32.xlu1 %v732_v27 }
 0x37e   : > { %v410_v28 = vpop.xlane.xlu1 %409 }
 0x37f   : > { %2162 = vrcp.f32 %v410_v28 }
 0x382   : > { %v987_v29 = vpop.permute.xlu1 %986 }
 0x383   : > { %2009 = vmatpush3.xpose.msk.msra.mxu0 %vm325_vm2, %v987_v29 }
 0x384   : > { %2018 = vmatprep.subr.mxu0 %v2347_v0 }
 0x386   : > { %v985_v30 = vpop.permute.xlu1 %984 }
 0x387   : > { %2011 = vmatmul.mubr.msk.f32.vlgmr.msra.gmra.mxu0 %vm325_vm2, %v985_v30 }
 0x388   : > { %2020 = vmatprep.mubr.msk.f32.mxu0 %vm2348_vm0, %v2347_v0 }
 0x38a   : > { %v1152_v31 = vpop.permute.xlu1 %1151 }
 0x38b   : > { %2019 = vmatpush3.xpose.msk.msra.mxu0 %vm325_vm2, %v1152_v31 }
 0x38c   : > { %v2163_v32 = vpop.eup %2162  ;;  %2028 = vmatprep.subr.mxu0 %v2347_v0 }
 0x38d   : > { %v412_v34 = vmul.f32 %v2163_v32, %v2161_v25 }
 0x38e   : > { %v1150_v35 = vpop.permute.xlu1 %1149 }
 0x38f   : > { %1976 = vmatmul.mubr.msk.f32.vlgmr.msra.gmra.mxu1 %vm401_vm3, %v412_v34  ;;  %2021 = vmatmul.mubr.msk.f32.vlgmr.msra.gmra.mxu0 %vm325_vm2, %v1150_v35 }
 0x390   : > { %1979 = vmatpush3.xpose.msk.msra.mxu1 %vm325_vm2, %v2559_v11  ;;  %2029 = vmatpush3.xpose.msk.msra.mxu0 %vm325_vm2, %v1317_v33 }
 0x391   : > { %1980 = vmatprep.mubr.msk.f32.mxu1 %vm2348_vm0, %v2347_v0  ;;  %2030 = vmatprep.mubr.msk.f32.mxu0 %vm2348_vm0, %v2347_v0 }
 0x392   : > { %v1315_v36 = vpop.permute.xlu1 %1314  ;;  %2038 = vmatprep.subr.mxu0 %v2347_v0  ;;  %1983 = vmatprep.subr.mxu1 %v2347_v0 }
 0x393   : > { %1981 = vmatmul.mubr.msk.f32.vlgmr.msra.gmra.mxu1 %vm325_vm2, %v2565_v12  ;;  %2031 = vmatmul.mubr.msk.f32.vlgmr.msra.gmra.mxu0 %vm325_vm2, %v1315_v36 }
 0x394   : > { %2039 = vmatpush3.xpose.msk.msra.mxu0 %vm325_vm2, %v1482_v37  ;;  %2040 = vmatprep.mubr.msk.f32.mxu0 %vm2348_vm0, %v2347_v0 }
 0x395   : > { %1985 = vmatprep.mubr.msk.f32.mxu1 %vm2348_vm0, %v2347_v0  ;;  %2048 = vmatprep.subr.mxu0 %v2347_v0 }
 0x396   : > { %v1480_v38 = vpop.permute.xlu1 %1479 }
 0x397   : > { %2041 = vmatmul.mubr.msk.f32.vlgmr.msra.gmra.mxu0 %vm325_vm2, %v1480_v38 }
 0x398   : > { %2056 = vmatprep.mubr.msk.f32.mxu0 %vm2348_vm0, %v2347_v0 }
 0x3a9   : > { %v893_v39 = vpop.f32.mrf.mxu0 }
 0x3aa   : > { %v897_v57 = vsel %vm401_vm3, %v893_v39, -inf }
 0x3ab   : > { %v2002_v40 = vpop.f32.mrf.mxu0 }
 0x3c7   : > { %v734_v41 = vpop.xlane.xlu1 %733 }
 0x3c8   : > { %v735_v42 = vsub.f32 %v2573_v18, %v734_v41 }
 0x3ca   : > { %v736_v44 = vmul.f32 1.442695, %v735_v42 }
 0x3cc   : > { %2164 = vpow2.f32 %v736_v44 }
 0x3d9   : > { %v2625_v59 = vpop.eup %2164 }
 0x3da   : > { %v738_v62 = vsel %vm401_vm3, %v2625_v59, 0.0 }
 0x447   : > { %v1058_v43 = vpop.f32.mrf.mxu0 }
 0x448   : > { %v1062_v61 = vsel %vm401_vm3, %v1058_v43, -inf }
 0x449   : > { %v2012_v45 = vpop.f32.mrf.mxu0 }
 0x44f   : > { %v2619_v46 = vpop.f32.mrf.mxu1  ;;  %v1223_v47 = vpop.f32.mrf.mxu0 }
 0x450   : > { %v1227_v48 = vsel %vm401_vm3, %v1223_v47, -inf }
 0x451   : > { %v1977_v49 = vpop.f32.mrf.mxu1  ;;  %1228 = vmax.xlane.f32.xlu1 %v1227_v48  ;;  %v2022_v50 = vpop.f32.mrf.mxu0 }
 0x453   : > { %v563_v51 = vpop.f32.mrf.mxu1  ;;  %v1388_v52 = vpop.f32.mrf.mxu0 }
 0x454   : > { %v567_v53 = vsel %vm401_vm3, %v563_v51, -inf  ;;  %v1392_v63 = vsel %vm401_vm3, %v1388_v52, -inf }
 0x455   : > { %568 = vmax.xlane.f32.xlu0 %v567_v53  ;;  %v1982_v54 = vpop.f32.mrf.mxu1  ;;  %v2032_v55 = vpop.f32.mrf.mxu0 }
 0x457   : > { %v1553_v56 = vpop.f32.mrf.mxu0 }
 0x458   : > { %v1557_v58 = vsel %vm401_vm3, %v1553_v56, -inf }
 0x459   : > { %898 = vmax.xlane.f32.xlu0 %v897_v57  ;;  %1558 = vmax.xlane.f32.xlu1 %v1557_v58  ;;  %v2042_v60 = vpop.f32.mrf.mxu0 }
 0x45d   : > { %1063 = vmax.xlane.f32.xlu0 %v1062_v61  ;;  %739 = vadd.xlane.f32.xlu1 %v738_v62 }
 0x461   : > { %1393 = vmax.xlane.f32.xlu0 %v1392_v63  ;;  %v1687_v63 = vld [vmem:[#allocation7 + $0x18] sm:$0xff] }
 0x462   : > { %2049 = vmatpush3.msra.mxu0 %v1687_v63 }
 0x463   : > { %2050 = vmatprep.subr.mxu0 %v2347_v0 }
 0x4da   : > { %v1229_v1 = vpop.xlane.xlu1 %1228 }
 0x4db   : > { %v1230_v3 = vsub.f32 %v1223_v47, %v1229_v1 }
 0x4dd   : > { %v1231_v8 = vmul.f32 1.442695, %v1230_v3  ;;  %v1686_v3 = vld [vmem:[#allocation7 + $0x10] sm:$0xff] }
 0x4de   : > { %v569_v2 = vpop.xlane.xlu0 %568  ;;  %2051 = vmatpush3.msra.mxu0 %v1686_v3 }
 0x4df   : > { %v570_v13 = vsub.f32 %v563_v51, %v569_v2  ;;  %2052 = vmatprep.subr.mxu0 %v2347_v0 }
 0x4e1   : > { %v571_v18 = vmul.f32 1.442695, %v570_v13 }
 0x4e2   : > { %v899_v4 = vpop.xlane.xlu0 %898  ;;  %v1559_v5 = vpop.xlane.xlu1 %1558 }
 0x4e3   : > { %v900_v7 = vsub.f32 %v893_v39, %v899_v4  ;;  %v1560_v10 = vsub.f32 %v1553_v56, %v1559_v5  ;;  %v1685_v4 = vld [vmem:[#allocation7 + $0x8] sm:$0xff] }
 0x4e4   : > { %2053 = vmatpush3.msra.mxu0 %v1685_v4 }
 0x4e5   : > { %v901_v9 = vmul.f32 1.442695, %v900_v7  ;;  %v1561_v14 = vmul.f32 1.442695, %v1560_v10  ;;  %2054 = vmatprep.subr.mxu0 %v2347_v0 }
 0x4e6   : > { %v1064_v11 = vpop.xlane.xlu0 %1063  ;;  %v740_v32 = vpop.xlane.xlu1 %739 }
 0x4e7   : > { %2166 = vpow2.f32 %v901_v9  ;;  %v1065_v12 = vsub.f32 %v1058_v43, %v1064_v11 }
 0x4e8   : > { %2168 = vpow2.f32 %v1231_v8  ;;  %v1684_v8 = vld [vmem:[#allocation7] sm:$0xff] }
 0x4e9   : > { %v1066_v15 = vmul.f32 1.442695, %v1065_v12  ;;  %2055 = vmatpush3.msra.mxu0 %v1684_v8 }
 0x4ea   : > { %v1394_v16 = vpop.xlane.xlu0 %1393 }
 0x4eb   : > { %2170 = vpow2.f32 %v1066_v15  ;;  %v1395_v17 = vsub.f32 %v1388_v52, %v1394_v16 }
 0x4ec   : > { %2172 = vpow2.f32 %v1561_v14 }
 0x4ed   : > { %v1396_v19 = vmul.f32 1.442695, %v1395_v17 }
 0x4ef   : > { %2174 = vpow2.f32 %v1396_v19 }
 0x4f0   : > { %2176 = vpow2.f32 %v571_v18 }
 0x4f4   : > { %v2631_v20 = vpop.eup %2166 }
 0x4f5   : > { %v903_v21 = vsel %vm401_vm3, %v2631_v20, 0.0  ;;  %v2635_v22 = vpop.eup %2168 }
 0x4f6   : > { %904 = vadd.xlane.f32.xlu0 %v903_v21  ;;  %v1233_v24 = vsel %vm401_vm3, %v2635_v22, 0.0 }
 0x4f8   : > { %v2637_v23 = vpop.eup %2170 }
 0x4f9   : > { %v1068_v25 = vsel %vm401_vm3, %v2637_v23, 0.0  ;;  %v2643_v26 = vpop.eup %2172 }
 0x4fa   : > { %1234 = vadd.xlane.f32.xlu0 %v1233_v24  ;;  %1069 = vadd.xlane.f32.xlu1 %v1068_v25  ;;  %v1563_v29 = vsel %vm401_vm3, %v2643_v26, 0.0 }
 0x4fc   : > { %v2645_v27 = vpop.eup %2174 }
 0x4fd   : > { %v1398_v28 = vsel %vm401_vm3, %v2645_v27, 0.0  ;;  %v2177_v30 = vpop.eup %2176 }
 0x4fe   : > { %1399 = vadd.xlane.f32.xlu1 %v1398_v28  ;;  %1564 = vadd.xlane.f32.xlu0 %v1563_v29  ;;  %v573_v31 = vsel %vm401_vm3, %v2177_v30, 0.0 }
 0x502   : > { %574 = vadd.xlane.f32.xlu0 %v573_v31 }
 0x50f   : > { %578 = vrot.lane.b32.xlu1 %v2550_v6, %s2365_s23 }
 0x513   : > { %908 = vrot.lane.b32.xlu1 %v2550_v6, %s2366_s29  ;;  %s1912_s29 = sshll.u32 %s2426_s19, 7  ;;  %s2379_s19 = smov [#allocation8]  }
 0x517   : > { %1073 = vrot.lane.b32.xlu1 %v2550_v6, %s2367_s5  ;;  %s241_s5 = scalar_lea.vmem [#allocation8], %s1880_s8  ;;  %s2276_s8 = sshll.u32 %s2379_s19, 4  ;;  %s2277_s8 = int_to_ptr.vmem [resolvable:$false] %s2276_s8 }
 0x518   : > { %743 = vrot.lane.b32.xlu0 %v2550_v6, %s2368_s6  ;;  %s1783_s6 = sshll.u32 %s241_s5, 4  ;;  %s1784_s6 = int_to_ptr.vmem [resolvable:$true] %s1783_s6 }
 0x519   : > { %p2279_p6 = scmp.lt.s32.totalorder %s1784_s6, %s2277_s8 }
 0x51b   : > { %1403 = vrot.lane.b32.xlu1 %v2550_v6, %s2369_s7 }
 0x51c   : > { %1238 = vrot.lane.b32.xlu0 %v2550_v6, %s2370_s12 }
 0x520   : > { %1568 = vrot.lane.b32.xlu0 %v2550_v6, %s2371_s13  ;;  %s2706_s13 = scalar_lea.hbm %s2748_s4, %s1912_s29 }
 0x57f   : > { %v905_v33 = vpop.xlane.xlu0 %904 }
 0x583   : > { %v1235_v34 = vpop.xlane.xlu0 %1234  ;;  %v1070_v35 = vpop.xlane.xlu1 %1069 }
 0x587   : > { %v1565_v36 = vpop.xlane.xlu0 %1564  ;;  %v1400_v37 = vpop.xlane.xlu1 %1399 }
 0x58b   : > { %v575_v38 = vpop.xlane.xlu0 %574  ;;  %v579_v39 = vpop.permute.xlu1 %578 }
 0x58c   : > { %2178 = vrcp.f32 %v575_v38  ;;  %1984 = vmatpush3.msra.mxu1 %v579_v39 }
 0x58d   : > { %1993 = vmatprep.subr.mxu1 %v2347_v0  ;;  %2180 = vrcp.f32 %v740_v32 }
 0x58e   : > { %2182 = vrcp.f32 %v905_v33 }
 0x58f   : > { %2184 = vrcp.f32 %v1070_v35  ;;  %v744_v6 = vpop.permute.xlu0 %743  ;;  %v909_v43 = vpop.permute.xlu1 %908 }
 0x590   : > { %2186 = vrcp.f32 %v1235_v34 }
 0x591   : > { %2188 = vrcp.f32 %v1400_v37 }
 0x592   : > { %2190 = vrcp.f32 %v1565_v36 }
 0x593   : > { %v1074_v49 = vpop.permute.xlu1 %1073  ;;  %v1239_v52 = vpop.permute.xlu0 %1238 }
 0x597   : > { %v1404_v55 = vpop.permute.xlu1 %1403  ;;  %v1569_v58 = vpop.permute.xlu0 %1568 }
 0x599   : > { %v2179_v40 = vpop.eup %2178 }
 0x59a   : > { %v577_v41 = vmul.f32 %v2179_v40, %v2177_v30  ;;  %v2181_v42 = vpop.eup %2180 }
 0x59b   : > { %v742_v44 = vmul.f32 %v2181_v42, %v2625_v59  ;;  %v2183_v45 = vpop.eup %2182 }
 0x59c   : > { %1986 = vmatmul.mubr.msk.f32.vlgmr.msra.gmra.mxu1 %vm401_vm3, %v577_v41  ;;  %v907_v47 = vmul.f32 %v2183_v45, %v2631_v20  ;;  %v2185_v48 = vpop.eup %2184 }
 0x59d   : > { %1994 = vmatpush3.msra.mxu1 %v744_v6  ;;  %1995 = vmatprep.mubr.msk.f32.mxu1 %vm2348_vm0, %v2347_v0  ;;  %v1072_v50 = vmul.f32 %v2185_v48, %v2637_v23  ;;  %v2187_v51 = vpop.eup %2186 }
 0x59e   : > { %2003 = vmatprep.subr.mxu1 %v2347_v0  ;;  %v1237_v53 = vmul.f32 %v2187_v51, %v2635_v22  ;;  %v2189_v54 = vpop.eup %2188 }
 0x59f   : > { %v1402_v56 = vmul.f32 %v2189_v54, %v2645_v27  ;;  %v2191_v57 = vpop.eup %2190 }
 0x5a0   : > { %1996 = vmatmul.mubr.msk.f32.vlgmr.msra.gmra.mxu1 %vm401_vm3, %v742_v44  ;;  %v1567_v59 = vmul.f32 %v2191_v57, %v2643_v26 }
 0x5a1   : > { %2004 = vmatpush3.msra.mxu1 %v909_v43  ;;  %2005 = vmatprep.mubr.msk.f32.mxu1 %vm2348_vm0, %v2347_v0 }
 0x5a2   : > { %2013 = vmatprep.subr.mxu1 %v2347_v0 }
 0x5a4   : > { %2006 = vmatmul.mubr.msk.f32.vlgmr.msra.gmra.mxu1 %vm401_vm3, %v907_v47 }
 0x5a5   : > { %2014 = vmatpush3.msra.mxu1 %v1074_v49  ;;  %2015 = vmatprep.mubr.msk.f32.mxu1 %vm2348_vm0, %v2347_v0 }
 0x5a6   : > { %2023 = vmatprep.subr.mxu1 %v2347_v0 }
 0x5a8   : > { %2016 = vmatmul.mubr.msk.f32.vlgmr.msra.gmra.mxu1 %vm401_vm3, %v1072_v50 }
 0x5a9   : > { %2024 = vmatpush3.msra.mxu1 %v1239_v52  ;;  %2025 = vmatprep.mubr.msk.f32.mxu1 %vm2348_vm0, %v2347_v0 }
 0x5aa   : > { %2033 = vmatprep.subr.mxu1 %v2347_v0 }
 0x5ac   : > { %2026 = vmatmul.mubr.msk.f32.vlgmr.msra.gmra.mxu1 %vm401_vm3, %v1237_v53 }
 0x5ad   : > { %2034 = vmatpush3.msra.mxu1 %v1404_v55  ;;  %2035 = vmatprep.mubr.msk.f32.mxu1 %vm2348_vm0, %v2347_v0 }
 0x5ae   : > { %2043 = vmatprep.subr.mxu1 %v2347_v0 }
 0x5b0   : > { %2036 = vmatmul.mubr.msk.f32.vlgmr.msra.gmra.mxu1 %vm401_vm3, %v1402_v56 }
 0x5b1   : > { %2044 = vmatpush3.msra.mxu1 %v1569_v58  ;;  %2045 = vmatprep.mubr.msk.f32.mxu1 %vm2348_vm0, %v2347_v0 }
 0x5b4   : > { %2046 = vmatmul.mubr.msk.f32.vlgmr.msra.gmra.mxu1 %vm401_vm3, %v1567_v59 }
 0x65c   : > { %v650_v60 = vpop.f32.mrf.mxu1 }
 0x65d   : > { %1645 = vrot.lane.b32.xlu1 %v650_v60, %s2372_s25  ;;  %s1770_s25 = scalar_lea.sflag [#allocation4], %s2523_s30 }
 0x65e   : > { %v1987_v61 = vpop.f32.mrf.mxu1 }
 0x660   : > { %v815_v62 = vpop.f32.mrf.mxu1 }
 0x661   : > { %1649 = vrot.lane.b32.xlu0 %v815_v62, %s2373_s26  ;;  %s2272_s26 = scalar_lea.vmem %s1784_s6, 128 }
 0x662   : > { %v1997_v1 = vpop.f32.mrf.mxu1  ;;  %p2273_p11 = scmp.ne.s32.totalorder %s1784_s6, %s2272_s26 }
 0x664   : > { %v980_v2 = vpop.f32.mrf.mxu1  ;;  %p2274_p1 = pnand %p2273_p11, %p2764_p0 }
 0x665   : > { %1653 = vrot.lane.b32.xlu1 %v980_v2, %s2374_s24  ;;  %s2278_s24 = scalar_lea.vmem %s2277_s8, 256 }
 0x666   : > { %v2007_v5 = vpop.f32.mrf.mxu1  ;;  %p2275_p2 = pneg %p2274_p1  ;;  %p2280_p12 = scmp.lt.s32.totalorder %s2278_s24, %s2272_s26 }
 0x668   : > { %v1145_v7 = vpop.f32.mrf.mxu1  ;;  %p2281_p7 = por %p2280_p12, %p2279_p6 }
 0x669   : > { %1657 = vrot.lane.b32.xlu0 %v1145_v7, %s2375_s27 }
 0x66a   : > { %v2017_v9 = vpop.f32.mrf.mxu1  ;;  %p2282_p9 = pnand %p2281_p7, %p2275_p2 }
 0x66c   : > { %v1310_v10 = vpop.f32.mrf.mxu1 }
 0x66d   : > { %1661 = vrot.lane.b32.xlu1 %v1310_v10, %s2376_s28 }
 0x66e   : > { %v2027_v11 = vpop.f32.mrf.mxu1 }
 0x670   : > { %v1475_v12 = vpop.f32.mrf.mxu1 }
 0x671   : > { %1665 = vrot.lane.b32.xlu0 %v1475_v12, %s2377_s9 }
 0x672   : > { %v2037_v13 = vpop.f32.mrf.mxu1 }
 0x674   : > { %v1640_v14 = vpop.f32.mrf.mxu1 }
 0x675   : > { %1669 = vrot.lane.b32.xlu1 %v1640_v14, %s2378_s10 }
 0x676   : > { %v2047_v15 = vpop.f32.mrf.mxu1 }
 0x6cf   : > { %v1646_v16 = vpop.permute.xlu1 %1645 }
 0x6d0   : > { %v1672_v19 = vsel %vm325_vm2, %v2619_v46, %v1646_v16  ;;  %v1909_v46 = vld [vmem:[%s2747_s3] ss:$0 sm:$0xff] }
 0x6d3   : > { %v1650_v17 = vpop.permute.xlu0 %1649 }
 0x6d4   : > { %v1673_v20 = vsel %vm401_vm3, %v1672_v19, %v1650_v17 }
 0x6d7   : > { %v1654_v0 = vpop.permute.xlu1 %1653 }
 0x6d8   : > { %v1675_v22 = vsel %vm1674_vm4, %v1673_v20, %v1654_v0 }
 0x6db   : > { %v1658_v18 = vpop.permute.xlu0 %1657 }
 0x6dc   : > { %v1677_v24 = vsel %vm1676_vm5, %v1675_v22, %v1658_v18 }
 0x6df   : > { %v1662_v21 = vpop.permute.xlu1 %1661 }
 0x6e0   : > { %v1679_v25 = vsel %vm1678_vm6, %v1677_v24, %v1662_v21 }
 0x6e3   : > { %v1666_v23 = vpop.permute.xlu0 %1665 }
 0x6e4   : > { %v1681_v26 = vsel %vm1680_vm7, %v1679_v25, %v1666_v23 }
 0x6e7   : > { %v1670_v27 = vpop.permute.xlu1 %1669 }
 0x6e8   : > { %v1683_v28 = vsel %vm1682_vm8, %v1681_v26, %v1670_v27 }
 0x6e9   : > { %2057 = vmatmul.mubr.msk.f32.vlgmr.msra.gmra.mxu0 %vm247_vm1, %v1683_v28 }
 0x7a9   : > { %v1764_v29 = vpop.f32.mrf.mxu0 }
 0x7aa   : > { %v1765_v30 = vadd.f32 %v1909_v46, %v1764_v29 }
 0x7ab   : > { %v2058_v31 = vpop.f32.mrf.mxu0 }
 0x7ac   : > { %1768 = vst.msk [vmem:[%s241_s5] sm:$0xff] %vm247_vm1, %v1765_v30 }
 0x7ad   : > { %2285 = shalt.err (!%p2282_p9)
}
 0x7ae   : > { %s2286_s27 = scalar_lea.hbm %s2706_s13, 128  ;;  %s2290_s9 = scalar_lea.hbm %s2748_s4, 256 }
 0x7af   : > { %p2287_p13 = scmp.ne.s32.totalorder %s2706_s13, %s2286_s27  ;;  %p2291_p4 = scmp.lt.s32.totalorder %s2706_s13, %s2748_s4 }
 0x7b0   : > { %p2292_p8 = scmp.lt.s32.totalorder %s2290_s9, %s2286_s27 }
 0x7b1   : > { %p2288_p5 = pnand %p2287_p13, %p2764_p0 }
 0x7b2   : > { %p2293_p3 = por %p2292_p8, %p2291_p4 }
 0x7b3   : > { %p2289_p10 = pneg %p2288_p5 }
 0x7b5   : > { %p2294_p11 = pnand %p2293_p3, %p2289_p10 }
 0x7b7   : > { %2297 = shalt.err (!%p2294_p11)
}
 0x7b8   : > { %2069 = dma.vmem_to_hbm [thread:$0]  (%p2764_p0), %s1784_s6, 128, %s2706_s13, %s1770_s25  }
 0x7b9 PF: > { %s1795_s23 = sand.u32 1, %s2328_s15   ;;  %p2765_p1 = scmp.ne.s32.totalorder %s2754_s22, 0 }
 0x7ba   : > { %p2766_p2 = scmp.ge.s32.totalorder %s2340_s18, 2  ;;  %s1796_s29 = scalar_lea.sflag [#allocation4], %s1795_s23 }
 0x7bc   : > { %p2083_p6 = pnand %p2766_p2, %p2765_p1 }
 0x7be   : > { %p2084_p12 = pneg %p2083_p6 }
 0x7c0   : > { %2323 = dma.done.wait (%p2084_p12), %s1796_s29, 128  }
 0x7c1   : > { %2325 = vsyncadd (%p2084_p12), %s1796_s29, 4294967168  ;;  %p18_p7 = scmp.ge.s32.totalorder %s2477_s11, 4   ;;  %s2767_s15 = smov %s2332_s16 }
 0x7c2   : > { %s2768_s16 = smov %s2336_s17  ;;  %s2769_s17 = smov %s2493_s20 }
 0x7c3   : > { %s2770_s18 = smov %s2477_s11  ;;  %20 = sbr.rel (!%p18_p7) target bundleno = 6 (0x6), region = 89 }
 0x7c8   :  { %1801 = vsyncpa [#allocation3], 1 }
 0x7c9   :  { %1803 = vsyncpa [#allocation3 + $0x1], 1 }
 0x7ca   :  { %1804 = vsyncpa [#allocation6], 1 }
 0x7cb   :  { %1805 = vsyncpa [#allocation4], 1 }
 0x7cc   :  { %1807 = vsyncpa [#allocation4 + $0x1], 1 }

</bundles_post_ra>
